<compile_context>
chip_gen: v6e
topology: v6e:2x2x1
jax: 0.10.0
libtpu: 0.0.40
codegen_flags: <defaults>
</compile_context>

<pallas_src>
import functools

import jax
import jax.numpy as jnp
from jax.experimental import pallas as pl
from jax.experimental.pallas import tpu as pltpu

_LANE = 128


def _vmem_limit_bytes():
    """Scoped-VMEM limit with headroom, derived from the chip's capacity."""
    try:
        cap = pltpu.get_tpu_info().vmem_capacity_bytes
    except Exception:  # pragma: no cover - conservative fallback
        cap = 64 * 1024 * 1024
    return int(min(cap * 3 // 4, 96 * 1024 * 1024))


def _choose_tile_d(d, n_rows, itemsize):
    """Pick a lane-aligned feature tile that keeps the per-step footprint small.

    Footprint per feature column ~= 2 inputs x 2 pipeline buffers x itemsize
    plus ~6 f32 temporaries (casts, centered samples, running products).
    """
    budget = 28 * 1024 * 1024
    per_col = max(1, n_rows * (4 * itemsize + 6 * 4))
    max_tile = budget // per_col
    tile = (max_tile // _LANE) * _LANE
    tile = max(_LANE, min(2048, tile))
    # Never wider than the 128-padded feature dim.
    return min(tile, pl.cdiv(d, _LANE) * _LANE)


def _cmd_partial_kernel(x1_ref, x2_ref, o_ref, *, n_moments: int):
    # x1_ref: (N1, TILE_D), x2_ref: (N2, TILE_D), o_ref: (1, 1, 128).
    x1 = x1_ref[...].astype(jnp.float32)
    x2 = x2_ref[...].astype(jnp.float32)

    # First moment (means over the batch axis of this feature slice).
    mx1 = jnp.mean(x1, axis=0, keepdims=True)     # (1, TILE_D)
    mx2 = jnp.mean(x2, axis=0, keepdims=True)     # (1, TILE_D)
    sx1 = x1 - mx1
    sx2 = x2 - mx2

    d0 = mx1 - mx2
    partials = [jnp.sum(d0 * d0)]                 # per-moment partial sq-diff sums

    # Higher central moments k = 2 .. n_moments via running products.
    p1 = sx1
    p2 = sx2
    for _ in range(2, n_moments + 1):
        p1 = p1 * sx1
        p2 = p2 * sx2
        ss1 = jnp.mean(p1, axis=0, keepdims=True)
        ss2 = jnp.mean(p2, axis=0, keepdims=True)
        dd = ss1 - ss2
        partials.append(jnp.sum(dd * dd))

    # Scatter the n_moments scalars into lanes 0..n_moments-1 of the output.
    lane = jax.lax.broadcasted_iota(jnp.int32, o_ref.shape, 2)
    out = jnp.zeros(o_ref.shape, jnp.float32)
    for m, s in enumerate(partials):
        out = jnp.where(lane == m, s, out)
    o_ref[...] = out


@functools.partial(jax.jit, static_argnames=("n_moments", "tile_d"))
def cmd_pallas(x1, x2, n_moments: int = 5, tile_d=None):
    assert x1.ndim == 2 and x2.ndim == 2 and x1.shape[1] == x2.shape[1]
    assert 1 <= n_moments <= _LANE
    n1, d = x1.shape
    n2, _ = x2.shape

    if tile_d is None:
        n_rows = max(n1, n2)
        itemsize = max(jnp.dtype(x1.dtype).itemsize, jnp.dtype(x2.dtype).itemsize)
        tile_d = _choose_tile_d(d, n_rows, itemsize)
    assert tile_d % _LANE == 0, "tile_d must be a multiple of 128 lanes"

    # Zero-pad the feature dim to a multiple of tile_d (exact for CMD).
    d_pad = pl.cdiv(d, tile_d) * tile_d
    if d_pad != d:
        x1 = jnp.pad(x1, ((0, 0), (0, d_pad - d)))
        x2 = jnp.pad(x2, ((0, 0), (0, d_pad - d)))
    num_tiles = d_pad // tile_d

    kernel = functools.partial(_cmd_partial_kernel, n_moments=n_moments)

    partials = pl.pallas_call(
        kernel,
        out_shape=jax.ShapeDtypeStruct((num_tiles, 1, _LANE), jnp.float32),
        grid=(num_tiles,),
        in_specs=[
            pl.BlockSpec((n1, tile_d), lambda j: (0, j)),
            pl.BlockSpec((n2, tile_d), lambda j: (0, j)),
        ],
        out_specs=pl.BlockSpec((1, 1, _LANE), lambda j: (j, 0, 0)),
        compiler_params=pltpu.CompilerParams(
            dimension_semantics=("parallel",),
            vmem_limit_bytes=_vmem_limit_bytes(),
        ),
    )(x1, x2)

    # Finalize: O(num_tiles * n_moments) scalars -> sum over tiles, sqrt per
    # moment, sum over moments.  Negligible; done in plain JAX.
    per_moment = jnp.sum(partials[:, 0, :n_moments], axis=0)   # (n_moments,)
    return jnp.sum(jnp.sqrt(per_moment))


def cmd_reference(x1, x2, n_moments: int = 5):
    """Pure-JAX reference mirroring the PyTorch module exactly."""
    x1 = x1.astype(jnp.float32)
    x2 = x2.astype(jnp.float32)
    mx1 = jnp.mean(x1, axis=0)
    mx2 = jnp.mean(x2, axis=0)
    sx1 = x1 - mx1
    sx2 = x2 - mx2

    def matchnorm(a, b):
        return jnp.sum((a - b) ** 2) ** 0.5

    scms = matchnorm(mx1, mx2)
    for i in range(n_moments - 1):
        k = i + 2
        ss1 = jnp.mean(sx1 ** k, axis=0)
        ss2 = jnp.mean(sx2 ** k, axis=0)
        scms = scms + matchnorm(ss1, ss2)
    return scms


if __name__ == "__main__":
    key = jax.random.PRNGKey(0)
    k1, k2, k3, k4 = jax.random.split(key, 4)

    # Case 1: small shapes (single D-tile, feature dim padded 32 -> 128).
    N, D = 8, 32
    x1 = jax.random.normal(k1, (N, D), dtype=jnp.float32)
    x2 = jax.random.normal(k2, (N, D), dtype=jnp.float32) * 1.3 + 0.2

    out = cmd_pallas(x1, x2, n_moments=5)
    out = jax.block_until_ready(out)
    ref = cmd_reference(x1, x2, n_moments=5)
    assert jnp.allclose(out, ref, rtol=1e-4, atol=1e-5), (out, ref)

    # Case 2: multi-tile path (D=300 forced to 128-wide tiles -> 3 tiles,
    # exercises the parallel grid and last-tile zero padding).
    N2, D2 = 16, 300
    y1 = jax.random.normal(k3, (N2, D2), dtype=jnp.float32)
    y2 = jax.random.normal(k4, (N2, D2), dtype=jnp.float32) * 0.7 - 0.1

    out2 = cmd_pallas(y1, y2, n_moments=5, tile_d=128)
    out2 = jax.block_until_ready(out2)
    ref2 = cmd_reference(y1, y2, n_moments=5)
    assert jnp.allclose(out2, ref2, rtol=1e-4, atol=1e-5), (out2, ref2)

    print("KERNEL_OK")
</pallas_src>

<mosaic_0001>
module attributes {stable_mosaic.version = 11 : i64} {
  func.func @_cmd_partial_kernel(%arg0: i32, %arg1: memref<8x128xf32, #tpu.memory_space<vmem>>, %arg2: memref<8x128xf32, #tpu.memory_space<vmem>>, %arg3: memref<1x1x128xf32, #tpu.memory_space<vmem>>) attributes {dimension_semantics = [#tpu.dimension_semantics<parallel>], iteration_bounds = array<i64: 1>, scalar_prefetch = 0 : i64, scratch_operands = 0 : i64, tpu.core_type = #tpu.core_type<tc>, window_params = [{transform_indices = @transform_0, window_bounds = array<i64: 8, 128>}, {transform_indices = @transform_1, window_bounds = array<i64: 8, 128>}, {transform_indices = @transform_2, window_bounds = array<i64: 1, 1, 128>}]} {
    %c0 = arith.constant 0 : index
    %c0_0 = arith.constant 0 : index
    %0 = vector.load %arg1[%c0, %c0_0] : memref<8x128xf32, #tpu.memory_space<vmem>>, vector<8x128xf32>
    %c0_1 = arith.constant 0 : index
    %c0_2 = arith.constant 0 : index
    %1 = vector.load %arg2[%c0_1, %c0_2] : memref<8x128xf32, #tpu.memory_space<vmem>>, vector<8x128xf32>
    %cst = arith.constant dense<0.000000e+00> : vector<128xf32>
    %2 = vector.multi_reduction <add>, %0, %cst [0] : vector<8x128xf32> to vector<128xf32>
    %3 = vector.shape_cast %2 : vector<128xf32> to vector<1x128xf32>
    %cst_3 = arith.constant 8.000000e+00 : f32
    %4 = vector.broadcast %cst_3 : f32 to vector<1x128xf32>
    %5 = arith.divf %3, %4 : vector<1x128xf32>
    %cst_4 = arith.constant dense<0.000000e+00> : vector<128xf32>
    %6 = vector.multi_reduction <add>, %1, %cst_4 [0] : vector<8x128xf32> to vector<128xf32>
    %7 = vector.shape_cast %6 : vector<128xf32> to vector<1x128xf32>
    %cst_5 = arith.constant 8.000000e+00 : f32
    %8 = vector.broadcast %cst_5 : f32 to vector<1x128xf32>
    %9 = arith.divf %7, %8 : vector<1x128xf32>
    %10 = vector.broadcast %5 : vector<1x128xf32> to vector<8x128xf32>
    %11 = arith.subf %0, %10 : vector<8x128xf32>
    %12 = vector.broadcast %9 : vector<1x128xf32> to vector<8x128xf32>
    %13 = arith.subf %1, %12 : vector<8x128xf32>
    %14 = arith.subf %5, %9 : vector<1x128xf32>
    %15 = arith.mulf %14, %14 : vector<1x128xf32>
    %16 = vector.shape_cast %15 : vector<1x128xf32> to vector<1x1x128xf32>
    %cst_6 = arith.constant dense<0.000000e+00> : vector<1xf32>
    %17 = vector.multi_reduction <add>, %16, %cst_6 [1, 2] : vector<1x1x128xf32> to vector<1xf32>
    %18 = vector.shape_cast %17 : vector<1xf32> to vector<1x1x1xf32>
    %19 = vector.extract %18[0, 0, 0] : f32 from vector<1x1x1xf32>
    %20 = arith.mulf %11, %11 : vector<8x128xf32>
    %21 = arith.mulf %13, %13 : vector<8x128xf32>
    %cst_7 = arith.constant dense<0.000000e+00> : vector<128xf32>
    %22 = vector.multi_reduction <add>, %20, %cst_7 [0] : vector<8x128xf32> to vector<128xf32>
    %23 = vector.shape_cast %22 : vector<128xf32> to vector<1x128xf32>
    %cst_8 = arith.constant 8.000000e+00 : f32
    %24 = vector.broadcast %cst_8 : f32 to vector<1x128xf32>
    %25 = arith.divf %23, %24 : vector<1x128xf32>
    %cst_9 = arith.constant dense<0.000000e+00> : vector<128xf32>
    %26 = vector.multi_reduction <add>, %21, %cst_9 [0] : vector<8x128xf32> to vector<128xf32>
    %27 = vector.shape_cast %26 : vector<128xf32> to vector<1x128xf32>
    %cst_10 = arith.constant 8.000000e+00 : f32
    %28 = vector.broadcast %cst_10 : f32 to vector<1x128xf32>
    %29 = arith.divf %27, %28 : vector<1x128xf32>
    %30 = arith.subf %25, %29 : vector<1x128xf32>
    %31 = arith.mulf %30, %30 : vector<1x128xf32>
    %32 = vector.shape_cast %31 : vector<1x128xf32> to vector<1x1x128xf32>
    %cst_11 = arith.constant dense<0.000000e+00> : vector<1xf32>
    %33 = vector.multi_reduction <add>, %32, %cst_11 [1, 2] : vector<1x1x128xf32> to vector<1xf32>
    %34 = vector.shape_cast %33 : vector<1xf32> to vector<1x1x1xf32>
    %35 = vector.extract %34[0, 0, 0] : f32 from vector<1x1x1xf32>
    %36 = arith.mulf %20, %11 : vector<8x128xf32>
    %37 = arith.mulf %21, %13 : vector<8x128xf32>
    %cst_12 = arith.constant dense<0.000000e+00> : vector<128xf32>
    %38 = vector.multi_reduction <add>, %36, %cst_12 [0] : vector<8x128xf32> to vector<128xf32>
    %39 = vector.shape_cast %38 : vector<128xf32> to vector<1x128xf32>
    %cst_13 = arith.constant 8.000000e+00 : f32
    %40 = vector.broadcast %cst_13 : f32 to vector<1x128xf32>
    %41 = arith.divf %39, %40 : vector<1x128xf32>
    %cst_14 = arith.constant dense<0.000000e+00> : vector<128xf32>
    %42 = vector.multi_reduction <add>, %37, %cst_14 [0] : vector<8x128xf32> to vector<128xf32>
    %43 = vector.shape_cast %42 : vector<128xf32> to vector<1x128xf32>
    %cst_15 = arith.constant 8.000000e+00 : f32
    %44 = vector.broadcast %cst_15 : f32 to vector<1x128xf32>
    %45 = arith.divf %43, %44 : vector<1x128xf32>
    %46 = arith.subf %41, %45 : vector<1x128xf32>
    %47 = arith.mulf %46, %46 : vector<1x128xf32>
    %48 = vector.shape_cast %47 : vector<1x128xf32> to vector<1x1x128xf32>
    %cst_16 = arith.constant dense<0.000000e+00> : vector<1xf32>
    %49 = vector.multi_reduction <add>, %48, %cst_16 [1, 2] : vector<1x1x128xf32> to vector<1xf32>
    %50 = vector.shape_cast %49 : vector<1xf32> to vector<1x1x1xf32>
    %51 = vector.extract %50[0, 0, 0] : f32 from vector<1x1x1xf32>
    %52 = arith.mulf %36, %11 : vector<8x128xf32>
    %53 = arith.mulf %37, %13 : vector<8x128xf32>
    %cst_17 = arith.constant dense<0.000000e+00> : vector<128xf32>
    %54 = vector.multi_reduction <add>, %52, %cst_17 [0] : vector<8x128xf32> to vector<128xf32>
    %55 = vector.shape_cast %54 : vector<128xf32> to vector<1x128xf32>
    %cst_18 = arith.constant 8.000000e+00 : f32
    %56 = vector.broadcast %cst_18 : f32 to vector<1x128xf32>
    %57 = arith.divf %55, %56 : vector<1x128xf32>
    %cst_19 = arith.constant dense<0.000000e+00> : vector<128xf32>
    %58 = vector.multi_reduction <add>, %53, %cst_19 [0] : vector<8x128xf32> to vector<128xf32>
    %59 = vector.shape_cast %58 : vector<128xf32> to vector<1x128xf32>
    %cst_20 = arith.constant 8.000000e+00 : f32
    %60 = vector.broadcast %cst_20 : f32 to vector<1x128xf32>
    %61 = arith.divf %59, %60 : vector<1x128xf32>
    %62 = arith.subf %57, %61 : vector<1x128xf32>
    %63 = arith.mulf %62, %62 : vector<1x128xf32>
    %64 = vector.shape_cast %63 : vector<1x128xf32> to vector<1x1x128xf32>
    %cst_21 = arith.constant dense<0.000000e+00> : vector<1xf32>
    %65 = vector.multi_reduction <add>, %64, %cst_21 [1, 2] : vector<1x1x128xf32> to vector<1xf32>
    %66 = vector.shape_cast %65 : vector<1xf32> to vector<1x1x1xf32>
    %67 = vector.extract %66[0, 0, 0] : f32 from vector<1x1x1xf32>
    %68 = arith.mulf %52, %11 : vector<8x128xf32>
    %69 = arith.mulf %53, %13 : vector<8x128xf32>
    %cst_22 = arith.constant dense<0.000000e+00> : vector<128xf32>
    %70 = vector.multi_reduction <add>, %68, %cst_22 [0] : vector<8x128xf32> to vector<128xf32>
    %71 = vector.shape_cast %70 : vector<128xf32> to vector<1x128xf32>
    %cst_23 = arith.constant 8.000000e+00 : f32
    %72 = vector.broadcast %cst_23 : f32 to vector<1x128xf32>
    %73 = arith.divf %71, %72 : vector<1x128xf32>
    %cst_24 = arith.constant dense<0.000000e+00> : vector<128xf32>
    %74 = vector.multi_reduction <add>, %69, %cst_24 [0] : vector<8x128xf32> to vector<128xf32>
    %75 = vector.shape_cast %74 : vector<128xf32> to vector<1x128xf32>
    %cst_25 = arith.constant 8.000000e+00 : f32
    %76 = vector.broadcast %cst_25 : f32 to vector<1x128xf32>
    %77 = arith.divf %75, %76 : vector<1x128xf32>
    %78 = arith.subf %73, %77 : vector<1x128xf32>
    %79 = arith.mulf %78, %78 : vector<1x128xf32>
    %80 = vector.shape_cast %79 : vector<1x128xf32> to vector<1x1x128xf32>
    %cst_26 = arith.constant dense<0.000000e+00> : vector<1xf32>
    %81 = vector.multi_reduction <add>, %80, %cst_26 [1, 2] : vector<1x1x128xf32> to vector<1xf32>
    %82 = vector.shape_cast %81 : vector<1xf32> to vector<1x1x1xf32>
    %83 = vector.extract %82[0, 0, 0] : f32 from vector<1x1x1xf32>
    %84 = tpu.iota {dimensions = array<i32: 2>} : vector<1x1x128xi32>
    %cst_27 = arith.constant 0.000000e+00 : f32
    %85 = vector.broadcast %cst_27 : f32 to vector<1x1x128xf32>
    %c0_i32 = arith.constant 0 : i32
    %86 = vector.broadcast %c0_i32 : i32 to vector<1x1x128xi32>
    %87 = arith.cmpi eq, %84, %86 : vector<1x1x128xi32>
    %88 = vector.broadcast %19 : f32 to vector<1x1x128xf32>
    %89 = arith.select %87, %88, %85 : vector<1x1x128xi1>, vector<1x1x128xf32>
    %c1_i32 = arith.constant 1 : i32
    %90 = vector.broadcast %c1_i32 : i32 to vector<1x1x128xi32>
    %91 = arith.cmpi eq, %84, %90 : vector<1x1x128xi32>
    %92 = vector.broadcast %35 : f32 to vector<1x1x128xf32>
    %93 = arith.select %91, %92, %89 : vector<1x1x128xi1>, vector<1x1x128xf32>
    %c2_i32 = arith.constant 2 : i32
    %94 = vector.broadcast %c2_i32 : i32 to vector<1x1x128xi32>
    %95 = arith.cmpi eq, %84, %94 : vector<1x1x128xi32>
    %96 = vector.broadcast %51 : f32 to vector<1x1x128xf32>
    %97 = arith.select %95, %96, %93 : vector<1x1x128xi1>, vector<1x1x128xf32>
    %c3_i32 = arith.constant 3 : i32
    %98 = vector.broadcast %c3_i32 : i32 to vector<1x1x128xi32>
    %99 = arith.cmpi eq, %84, %98 : vector<1x1x128xi32>
    %100 = vector.broadcast %67 : f32 to vector<1x1x128xf32>
    %101 = arith.select %99, %100, %97 : vector<1x1x128xi1>, vector<1x1x128xf32>
    %c4_i32 = arith.constant 4 : i32
    %102 = vector.broadcast %c4_i32 : i32 to vector<1x1x128xi32>
    %103 = arith.cmpi eq, %84, %102 : vector<1x1x128xi32>
    %104 = vector.broadcast %83 : f32 to vector<1x1x128xf32>
    %105 = arith.select %103, %104, %101 : vector<1x1x128xi1>, vector<1x1x128xf32>
    %c0_28 = arith.constant 0 : index
    %c0_29 = arith.constant 0 : index
    %c0_30 = arith.constant 0 : index
    %106 = vector.load %arg3[%c0_28, %c0_29, %c0_30] : memref<1x1x128xf32, #tpu.memory_space<vmem>>, vector<1x1x128xf32>
    tpu.vector_store %arg3[%c0_28, %c0_29, %c0_30], %105 {strides = array<i32>} : memref<1x1x128xf32, #tpu.memory_space<vmem>>, vector<1x1x128xf32>,
    return
  }
  func.func @transform_0(%arg0: i32) -> (i32, i32) {
    %c0_i32 = arith.constant 0 : i32
    %c0_i32_0 = arith.constant 0 : i32
    return %c0_i32, %arg0 : i32, i32
  }
  func.func @transform_1(%arg0: i32) -> (i32, i32) {
    %c0_i32 = arith.constant 0 : i32
    %c0_i32_0 = arith.constant 0 : i32
    return %c0_i32, %arg0 : i32, i32
  }
  func.func @transform_2(%arg0: i32) -> (i32, i32, i32) {
    %c0_i32 = arith.constant 0 : i32
    %c0_i32_0 = arith.constant 0 : i32
    %c0_i32_1 = arith.constant 0 : i32
    return %arg0, %c0_i32, %c0_i32_0 : i32, i32, i32
  }
}

</mosaic_0001>

<bundles_post_ra>
// kernel: cmd_pallas.1
= control target key start
LH: loop header
LB: loop body
LE: loop exit
PB: predicated region body
PF: predicated region fallthrough
CT: control target
= control target key end

     0   :  { %vm32_vm0 = vcmask 1040384   ;;  %s216_s0 = inlined_call_operand.vmem [shape: f32[8,128], index: 0, kind: input, shape index: {}]   ;;  %s217_s1 = inlined_call_operand.vmem [shape: f32[8,128], index: 1, kind: input, shape index: {}]   ;;  %s218_s2 = inlined_call_operand.vmem [shape: f32[1,1,128], index: 2, kind: output, shape index: {}]  }
   0x1   :  { %v11_v0 = vld [vmem:[%s216_s0] sm:$0xff] }
   0x2   :  { %v12_v1 = vld [vmem:[%s217_s1] sm:$0xff]  ;;  %v13_v2 = vrot.slane %v11_v0, 4 }
   0x3   :  { %v21_v3 = vrot.slane %v12_v1, 4 }
   0x4   :  { %v14_v4 = vadd.f32 %v13_v2, %v11_v0 }
   0x5   :  { %v22_v5 = vadd.f32 %v21_v3, %v12_v1 }
   0x6   :  { %v15_v6 = vrot.slane %v14_v4, 2 }
   0x7   :  { %v23_v7 = vrot.slane %v22_v5, 2 }
   0x8   :  { %v16_v8 = vadd.f32 %v15_v6, %v14_v4 }
   0x9   :  { %v24_v9 = vadd.f32 %v23_v7, %v22_v5 }
   0xa   :  { %v17_v10 = vrot.slane %v16_v8, 1 }
   0xb   :  { %v25_v11 = vrot.slane %v24_v9, 1 }
   0xc   :  { %v18_v12 = vadd.f32 %v17_v10, %v16_v8 }
   0xd   :  { %v26_v13 = vadd.f32 %v25_v11, %v24_v9 }
   0xe   :  { %v20_v14 = vmul.f32 0.125, %v18_v12 }
   0xf   :  { %v27_v15 = vmul.f32 0.125, %v26_v13 }
  0x10   :  { %v28_v18 = vsub.f32 %v11_v0, %v20_v14 }
  0x11   :  { %v29_v16 = vsub.f32 %v12_v1, %v27_v15  ;;  %v30_v17 = vsub.f32 %v20_v14, %v27_v15 }
  0x12   :  { %v43_v20 = vmul.f32 %v28_v18, %v28_v18 }
  0x13   :  { %v31_v19 = vmul.f32 %v30_v17, %v30_v17  ;;  %v44_v21 = vmul.f32 %v29_v16, %v29_v16 }
  0x14   :  { %v45_v23 = vrot.slane %v43_v20, 4  ;;  %v71_v25 = vmul.f32 %v43_v20, %v28_v18 }
  0x15   :  { %v33_v22 = vsel %vm32_vm0, %v31_v19, 0.0  ;;  %v52_v24 = vrot.slane %v44_v21, 4  ;;  %v72_v26 = vmul.f32 %v44_v21, %v29_v16 }
  0x16   :  { %34 = vadd.xlane.f32.xlu0 %v33_v22  ;;  %v46_v27 = vadd.f32 %v45_v23, %v43_v20  ;;  %v73_v29 = vrot.slane %v71_v25, 4  ;;  %v99_v30 = vmul.f32 %v71_v25, %v28_v18 }
  0x17   :  { %v53_v28 = vadd.f32 %v52_v24, %v44_v21  ;;  %v80_v31 = vrot.slane %v72_v26, 4  ;;  %v100_v32 = vmul.f32 %v72_v26, %v29_v16 }
  0x18   :  { %v47_v33 = vrot.slane %v46_v27, 2  ;;  %v74_v35 = vadd.f32 %v73_v29, %v71_v25  ;;  %v101_v36 = vrot.slane %v99_v30, 4  ;;  %v127_v39 = vmul.f32 %v99_v30, %v28_v18 }
  0x19   :  { %v54_v34 = vrot.slane %v53_v28, 2  ;;  %v81_v37 = vadd.f32 %v80_v31, %v72_v26  ;;  %v108_v38 = vrot.slane %v100_v32, 4  ;;  %v128_v40 = vmul.f32 %v100_v32, %v29_v16 }
  0x1a   :  { %v48_v41 = vadd.f32 %v47_v33, %v46_v27  ;;  %v75_v43 = vrot.slane %v74_v35, 2  ;;  %v102_v44 = vadd.f32 %v101_v36, %v99_v30  ;;  %v129_v47 = vrot.slane %v127_v39, 4 }
  0x1b   :  { %v55_v42 = vadd.f32 %v54_v34, %v53_v28  ;;  %v82_v45 = vrot.slane %v81_v37, 2  ;;  %v109_v46 = vadd.f32 %v108_v38, %v100_v32  ;;  %v136_v48 = vrot.slane %v128_v40, 4 }
  0x1c   :  { %v49_v49 = vrot.slane %v48_v41, 1  ;;  %v76_v51 = vadd.f32 %v75_v43, %v74_v35  ;;  %v103_v52 = vrot.slane %v102_v44, 2  ;;  %v130_v55 = vadd.f32 %v129_v47, %v127_v39 }
  0x1d   :  { %v56_v50 = vrot.slane %v55_v42, 1  ;;  %v83_v53 = vadd.f32 %v82_v45, %v81_v37  ;;  %v110_v54 = vrot.slane %v109_v46, 2  ;;  %v137_v56 = vadd.f32 %v136_v48, %v128_v40 }
  0x1e   :  { %v50_v57 = vadd.f32 %v49_v49, %v48_v41  ;;  %v77_v59 = vrot.slane %v76_v51, 1  ;;  %v104_v60 = vadd.f32 %v103_v52, %v102_v44  ;;  %v131_v63 = vrot.slane %v130_v55, 2 }
  0x1f   :  { %v57_v58 = vadd.f32 %v56_v50, %v55_v42  ;;  %v84_v61 = vrot.slane %v83_v53, 1  ;;  %v111_v62 = vadd.f32 %v110_v54, %v109_v46  ;;  %v138_v0 = vrot.slane %v137_v56, 2 }
  0x20   :  { %v51_v1 = vmul.f32 0.125, %v50_v57  ;;  %v78_v3 = vadd.f32 %v77_v59, %v76_v51  ;;  %v105_v4 = vrot.slane %v104_v60, 1  ;;  %v132_v7 = vadd.f32 %v131_v63, %v130_v55 }
  0x21   :  { %v58_v2 = vmul.f32 0.125, %v57_v58  ;;  %v85_v5 = vadd.f32 %v84_v61, %v83_v53  ;;  %v112_v6 = vrot.slane %v111_v62, 1  ;;  %v139_v8 = vadd.f32 %v138_v0, %v137_v56 }
  0x22   :  { %v79_v10 = vmul.f32 0.125, %v78_v3  ;;  %v106_v11 = vadd.f32 %v105_v4, %v104_v60  ;;  %v133_v14 = vrot.slane %v132_v7, 1  ;;  %v155_v4 = vlaneseq }
  0x23   :  { %v59_v9 = vsub.f32 %v51_v1, %v58_v2  ;;  %v86_v12 = vmul.f32 0.125, %v85_v5  ;;  %v113_v13 = vadd.f32 %v112_v6, %v111_v62  ;;  %v140_v15 = vrot.slane %v139_v8, 1 }
  0x24   :  { %v107_v17 = vmul.f32 0.125, %v106_v11  ;;  %v134_v20 = vadd.f32 %v133_v14, %v132_v7  ;;  %v156_v5 = vand.u32 127, %v155_v4 }
  0x25   :  { %v60_v16 = vmul.f32 %v59_v9, %v59_v9  ;;  %v87_v18 = vsub.f32 %v79_v10, %v86_v12  ;;  %v114_v19 = vmul.f32 0.125, %v113_v13  ;;  %v141_v21 = vadd.f32 %v140_v15, %v139_v8 }
  0x26   :  { %v135_v25 = vmul.f32 0.125, %v134_v20  ;;  %vm157_vm1 = vcmp.eq.s32.totalorder %v156_v5, 0  ;;  %vm160_vm2 = vcmp.eq.s32.totalorder %v156_v5, 1  ;;  %vm163_vm3 = vcmp.eq.s32.totalorder %v156_v5, 2 }
  0x27   :  { %v61_v22 = vsel %vm32_vm0, %v60_v16, 0.0  ;;  %v88_v23 = vmul.f32 %v87_v18, %v87_v18  ;;  %v115_v24 = vsub.f32 %v107_v17, %v114_v19  ;;  %v142_v26 = vmul.f32 0.125, %v141_v21 }
  0x28   :  { %62 = vadd.xlane.f32.xlu0 %v61_v22  ;;  %vm166_vm4 = vcmp.eq.s32.totalorder %v156_v5, 3  ;;  %vm169_vm5 = vcmp.eq.s32.totalorder %v156_v5, 4 }
  0x29   :  { %v89_v27 = vsel %vm32_vm0, %v88_v23, 0.0  ;;  %v116_v28 = vmul.f32 %v115_v24, %v115_v24  ;;  %v143_v29 = vsub.f32 %v135_v25, %v142_v26 }
  0x2a   :  { %90 = vadd.xlane.f32.xlu1 %v89_v27 }
  0x2b   :  { %v117_v30 = vsel %vm32_vm0, %v116_v28, 0.0  ;;  %v144_v31 = vmul.f32 %v143_v29, %v143_v29 }
  0x2d   :  { %v145_v32 = vsel %vm32_vm0, %v144_v31, 0.0 }
  0x2e   :  { %118 = vadd.xlane.f32.xlu1 %v117_v30  ;;  %146 = vadd.xlane.f32.xlu0 %v145_v32 }
  0x9f   :  { %v35_v33 = vpop.xlane.xlu0 %34 }
  0xa0   :  { %v36_v34 = vrot.slane %v35_v33, 4 }
  0xa2   :  { %v37_v35 = vadd.f32 %v36_v34, %v35_v33 }
  0xa4   :  { %v38_v36 = vrot.slane %v37_v35, 2 }
  0xa6   :  { %v39_v37 = vadd.f32 %v38_v36, %v37_v35 }
  0xa8   :  { %v40_v38 = vrot.slane %v39_v37, 1 }
  0xaa   :  { %v41_v39 = vadd.f32 %v40_v38, %v39_v37 }
  0xac   :  { %177 = vpush %v41_v39 }
  0xb1   :  { %v63_v40 = vpop.xlane.xlu0 %62 }
  0xb2   :  { %v64_v41 = vrot.slane %v63_v40, 4 }
  0xb3   :  { %v91_v43 = vpop.xlane.xlu1 %90 }
  0xb4   :  { %v65_v42 = vadd.f32 %v64_v41, %v63_v40  ;;  %v92_v44 = vrot.slane %v91_v43, 4 }
  0xb6   :  { %v66_v45 = vrot.slane %v65_v42, 2  ;;  %v93_v46 = vadd.f32 %v92_v44, %v91_v43 }
  0xb7   :  { %v119_v47 = vpop.xlane.xlu1 %118  ;;  %v147_v48 = vpop.xlane.xlu0 %146 }
  0xb8   :  { %v67_v49 = vadd.f32 %v66_v45, %v65_v42  ;;  %v94_v50 = vrot.slane %v93_v46, 2  ;;  %v120_v51 = vrot.slane %v119_v47, 4  ;;  %v148_v52 = vrot.slane %v147_v48, 4 }
  0xba   :  { %v68_v53 = vrot.slane %v67_v49, 1  ;;  %v121_v54 = vadd.f32 %v120_v51, %v119_v47  ;;  %v149_v55 = vadd.f32 %v148_v52, %v147_v48  ;;  %v95_v56 = vadd.f32 %v94_v50, %v93_v46 }
  0xbc   :  { %v69_v57 = vadd.f32 %v68_v53, %v67_v49  ;;  %v122_v58 = vrot.slane %v121_v54, 2  ;;  %v150_v59 = vrot.slane %v149_v55, 2  ;;  %v96_v60 = vrot.slane %v95_v56, 1 }
  0xbe   :  { %179 = vpush %v69_v57  ;;  %v123_v61 = vadd.f32 %v122_v58, %v121_v54  ;;  %v151_v62 = vadd.f32 %v150_v59, %v149_v55  ;;  %v97_v63 = vadd.f32 %v96_v60, %v95_v56 }
  0xc0   :  { %181 = vpush %v97_v63  ;;  %v124_v0 = vrot.slane %v123_v61, 1  ;;  %v152_v1 = vrot.slane %v151_v62, 1 }
  0xc2   :  { %v125_v2 = vadd.f32 %v124_v0, %v123_v61  ;;  %v153_v3 = vadd.f32 %v152_v1, %v151_v62 }
  0xc4   :  { %183 = vpush %v125_v2 }
  0xc5   :  { %185 = vpush %v153_v3 }
  0xdd   :  { %s178_s0 = spop %177 }
  0xde   :  { %v158_v6 = vstv %s178_s0 }
  0xdf   :  { %v159_v8 = vsel %vm157_vm1, %v158_v6, 0.0 }
  0xef   :  { %s180_s1 = spop %179 }
  0xf0   :  { %v161_v7 = vstv %s180_s1 }
  0xf1   :  { %s182_s13 = spop %181  ;;  %v162_v9 = vsel %vm160_vm2, %v161_v7, %v159_v8 }
  0xf2   :  { %v164_v10 = vstv %s182_s13 }
  0xf3   :  { %v165_v11 = vsel %vm163_vm3, %v164_v10, %v162_v9 }
  0xf5   :  { %s184_s14 = spop %183 }
  0xf6   :  { %v167_v12 = vstv %s184_s14  ;;  %s186_s15 = spop %185 }
  0xf7   :  { %v168_v13 = vsel %vm166_vm4, %v167_v12, %v165_v11  ;;  %v170_v14 = vstv %s186_s15 }
  0xf8   :  { %v171_v15 = vsel %vm169_vm5, %v170_v14, %v168_v13 }
  0xf9   :  { %172 = vst [vmem:[%s218_s2] sm:$0x1] %v171_v15 }

</bundles_post_ra>
